<compile_context>
chip_gen: v7x
topology: tpu7x:2x2x1
jax: 0.10.0
libtpu: 0.0.40
codegen_flags: <defaults>
</compile_context>

<pallas_src>
import functools
import math

import jax
import jax.numpy as jnp
from jax.experimental import pallas as pl
from jax.experimental.pallas import tpu as pltpu


# ----------------------------------------------------------------------------
# Parameter ("buffer") construction -- deterministic, mirrors __init__
# ----------------------------------------------------------------------------
def make_positional_encoding(d_model: int, max_len: int) -> jnp.ndarray:
    """Builds pe with shape (max_len, 1, d_model), matching the torch buffer."""
    position = jnp.arange(0, max_len, dtype=jnp.float32)[:, None]          # (max_len, 1)
    div_term = jnp.exp(
        jnp.arange(0, d_model, 2, dtype=jnp.float32)
        * (-math.log(10000.0) / d_model)
    )                                                                        # (d_model/2,)
    angles = position * div_term                                             # (max_len, d_model/2)
    pe = jnp.zeros((max_len, d_model), dtype=jnp.float32)
    pe = pe.at[:, 0::2].set(jnp.sin(angles))
    pe = pe.at[:, 1::2].set(jnp.cos(angles))
    # torch: pe.unsqueeze(0).transpose(0, 1) -> (max_len, 1, d_model)
    return pe[:, None, :]


# ----------------------------------------------------------------------------
# Pallas kernel: x block (TS, batch*d_model) + pe block (TS, d_model)
# broadcast over batch via lane concatenation.
# ----------------------------------------------------------------------------
def _pos_enc_kernel(x_ref, pe_ref, o_ref, *, batch: int):
    pe = pe_ref[...]                                   # (TS, d_model)
    if batch > 1:
        # Replicate the pe row `batch` times along the lane axis so it lines
        # up with the flattened (batch, d_model) layout of each x row.
        pe = jnp.concatenate([pe] * batch, axis=-1)    # (TS, batch*d_model)
    o_ref[...] = x_ref[...] + pe
    # TODO(synk): training-mode dropout (p=0.1) would need pltpu.prng_* masking;
    # inference/eval dropout is the identity, which is what is implemented.


def _choose_seq_tile(seq: int, bytes_per_row: int, itemsize: int) -> int:
    """Pick a seq tile giving ~1 MiB x-blocks, multiple of sublane granularity."""
    target_bytes = 1 << 20                               # ~1 MiB per x block
    rows = max(1, target_bytes // max(1, bytes_per_row))
    if rows >= seq:
        return seq                                       # single block (full dim -> legal)
    gran = max(8, 32 // max(1, itemsize))                # 8 (f32) / 16 (bf16) / 32 (i8)
    ts = max(gran, (rows // gran) * gran)
    return min(ts, seq)


def positional_encoding_forward(x: jnp.ndarray, pe: jnp.ndarray) -> jnp.ndarray:
    """x: (seq, batch, d_model); pe: (max_len, 1, d_model); returns x + pe[:seq]."""
    seq, batch, d_model = x.shape
    assert pe.shape[0] >= seq and pe.shape[-1] == d_model

    dtype = x.dtype
    itemsize = jnp.dtype(dtype).itemsize

    # Free row-major view: (seq, batch, d_model) -> (seq, batch*d_model).
    x2d = x.reshape(seq, batch * d_model)
    # pe sliced to seq, squeezed to 2-D and pre-cast to x.dtype (halves DMA
    # bytes for bf16 inputs and avoids a mixed-dtype promote in the kernel).
    pe2d = pe.reshape(pe.shape[0], d_model)[:seq].astype(dtype)

    ts = _choose_seq_tile(seq, batch * d_model * itemsize, itemsize)
    grid = (pl.cdiv(seq, ts),)

    kernel = functools.partial(_pos_enc_kernel, batch=batch)

    out2d = pl.pallas_call(
        kernel,
        out_shape=jax.ShapeDtypeStruct((seq, batch * d_model), dtype),
        grid_spec=pltpu.PrefetchScalarGridSpec(
            num_scalar_prefetch=0,
            grid=grid,
            in_specs=[
                pl.BlockSpec((ts, batch * d_model), lambda i: (i, 0)),
                pl.BlockSpec((ts, d_model), lambda i: (i, 0)),
            ],
            out_specs=pl.BlockSpec((ts, batch * d_model), lambda i: (i, 0)),
        ),
        compiler_params=pltpu.CompilerParams(
            dimension_semantics=("parallel",),
        ),
    )(x2d, pe2d)

    return out2d.reshape(seq, batch, d_model)


# ----------------------------------------------------------------------------
# Reference (pure JAX) for correctness check
# ----------------------------------------------------------------------------
def positional_encoding_ref(x, pe):
    return x + pe[: x.shape[0], :]


if __name__ == "__main__":
    d_model = 128
    max_len = 10
    seq, batch = 7, 4

    pe = make_positional_encoding(d_model, max_len)          # (10, 1, 128)

    key = jax.random.PRNGKey(0)
    x = jax.random.uniform(key, (seq, batch, d_model), dtype=jnp.float32)

    out = positional_encoding_forward(x, pe)
    out = jax.block_until_ready(out)

    ref = positional_encoding_ref(x, pe)
    assert out.shape == (seq, batch, d_model)
    assert jnp.allclose(out, ref, atol=1e-6, rtol=1e-6)

    print("KERNEL_OK")
</pallas_src>

<mosaic_0001>
module attributes {stable_mosaic.version = 11 : i64} {
  func.func @_pos_enc_kernel(%arg0: i32, %arg1: memref<7x512xf32, #tpu.memory_space<vmem>>, %arg2: memref<7x128xf32, #tpu.memory_space<vmem>>, %arg3: memref<7x512xf32, #tpu.memory_space<vmem>>) attributes {dimension_semantics = [#tpu.dimension_semantics<parallel>], iteration_bounds = array<i64: 1>, scalar_prefetch = 0 : i64, scratch_operands = 0 : i64, tpu.core_type = #tpu.core_type<tc>, window_params = [{transform_indices = @transform_0, window_bounds = array<i64: 7, 512>}, {transform_indices = @transform_1, window_bounds = array<i64: 7, 128>}, {transform_indices = @transform_2, window_bounds = array<i64: 7, 512>}]} {
    %c0 = arith.constant 0 : index
    %c0_0 = arith.constant 0 : index
    %0 = vector.load %arg2[%c0, %c0_0] : memref<7x128xf32, #tpu.memory_space<vmem>>, vector<7x128xf32>
    %1 = tpu.concatenate %0, %0, %0, %0 in 1 : vector<7x128xf32>, vector<7x128xf32>, vector<7x128xf32>, vector<7x128xf32> -> vector<7x512xf32>
    %c0_1 = arith.constant 0 : index
    %c0_2 = arith.constant 0 : index
    %2 = vector.load %arg1[%c0_1, %c0_2] : memref<7x512xf32, #tpu.memory_space<vmem>>, vector<7x512xf32>
    %3 = arith.addf %2, %1 : vector<7x512xf32>
    %c0_3 = arith.constant 0 : index
    %c0_4 = arith.constant 0 : index
    %4 = vector.load %arg3[%c0_3, %c0_4] : memref<7x512xf32, #tpu.memory_space<vmem>>, vector<7x512xf32>
    tpu.vector_store %arg3[%c0_3, %c0_4], %3 {strides = array<i32>} : memref<7x512xf32, #tpu.memory_space<vmem>>, vector<7x512xf32>,
    return
  }
  func.func @transform_0(%arg0: i32) -> (i32, i32) {
    %c0_i32 = arith.constant 0 : i32
    %c0_i32_0 = arith.constant 0 : i32
    return %arg0, %c0_i32 : i32, i32
  }
  func.func @transform_1(%arg0: i32) -> (i32, i32) {
    %c0_i32 = arith.constant 0 : i32
    %c0_i32_0 = arith.constant 0 : i32
    return %arg0, %c0_i32 : i32, i32
  }
  func.func @transform_2(%arg0: i32) -> (i32, i32) {
    %c0_i32 = arith.constant 0 : i32
    %c0_i32_0 = arith.constant 0 : i32
    return %arg0, %c0_i32 : i32, i32
  }
}

</mosaic_0001>

<bundles_post_ra>
// kernel: tpu_custom_call.1
= control target key start
LH: loop header
LB: loop body
LE: loop exit
PB: predicated region body
PF: predicated region fallthrough
CT: control target
= control target key end

     0   :  { %7 = vsyncpa [#allocation3], 0  ;;  %s194_s0 = inlined_call_operand.hbm [shape: f32[7,512], index: 0, kind: input, shape index: {}]   ;;  %s195_s1 = inlined_call_operand.hbm [shape: f32[7,128], index: 1, kind: input, shape index: {}]   ;;  %s196_s2 = inlined_call_operand.hbm [shape: f32[7,512], index: 2, kind: output, shape index: {}]  }
   0x1   :  { %8 = vsyncpa [#allocation6], 0 }
   0x2   :  { %9 = vsyncpa [#allocation4], 0  ;;  %s140_s9 = smov [#allocation2]   ;;  %s141_s11 = smov [#allocation5]  }
   0x3   :  { %s16_s10 = sshll.u32 %s140_s9, 4  ;;  %s26_s12 = sshll.u32 %s141_s11, 4  ;;  %s17_s10 = int_to_ptr.vmem [resolvable:$true] %s16_s10  ;;  %s27_s12 = int_to_ptr.vmem [resolvable:$true] %s26_s12 }
   0x4   :  { %s68_s15 = scalar_lea.hbm %s194_s0, 512 }
   0x5   :  { %p69_p0 = scmp.ne.s32.totalorder %s194_s0, %s68_s15  ;;  %p72_p1 = scmp.lt.u32.totalorder %s68_s15, %s194_s0 }
   0x7   :  { %p74_p2 = pnand %p72_p1, %p69_p0 }
   0x9   :  { %77 = shalt.err (!%p74_p2)
}
   0xa   :  { %s78_s20 = scalar_lea.vmem %s17_s10, 512  ;;  %p83_p4 = scmp.lt.s32.totalorder %s17_s10, %s17_s10 }
   0xb   :  { %p79_p3 = scmp.ne.s32.totalorder %s17_s10, %s78_s20  ;;  %p84_p5 = scmp.lt.s32.totalorder %s78_s20, %s78_s20 }
   0xd   :  { %p85_p6 = por %p84_p5, %p83_p4 }
   0xf   :  { %p86_p7 = pnand %p85_p6, %p79_p3 }
  0x11   :  { %89 = shalt.err (!%p86_p7)
}
  0x12   :  { %19 = dma.hbm_to_vmem [thread:$0]  %s194_s0, 512, %s17_s10, [#allocation3]  }
  0x13   :  { %s90_s25 = scalar_lea.hbm %s195_s1, 128 }
  0x14   :  { %p91_p8 = scmp.ne.s32.totalorder %s195_s1, %s90_s25  ;;  %p94_p9 = scmp.lt.u32.totalorder %s90_s25, %s195_s1 }
  0x16   :  { %p96_p10 = pnand %p94_p9, %p91_p8 }
  0x18   :  { %99 = shalt.err (!%p96_p10)
}
  0x19   :  { %s100_s30 = scalar_lea.vmem %s27_s12, 128  ;;  %p105_p12 = scmp.lt.s32.totalorder %s27_s12, %s27_s12 }
  0x1a   :  { %p101_p11 = scmp.ne.s32.totalorder %s27_s12, %s100_s30  ;;  %p106_p13 = scmp.lt.s32.totalorder %s100_s30, %s100_s30 }
  0x1c   :  { %p107_p0 = por %p106_p13, %p105_p12 }
  0x1e   :  { %p108_p1 = pnand %p107_p0, %p101_p11 }
  0x20   :  { %111 = shalt.err (!%p108_p1)
}
  0x21   :  { %29 = dma.hbm_to_vmem [thread:$0]  %s195_s1, 128, %s27_s12, [#allocation6]  }
  0x22   :  { %134 = dma.done.wait [#allocation3], 512  }
  0x23   :  { %135 = vsyncadd [#allocation3], 4294966784 }
  0x24   :  { %136 = dma.done.wait [#allocation6], 128  }
  0x25   :  { %137 = vsyncadd [#allocation6], 4294967168  ;;  %s142_s4 = smov [#allocation7]   ;;  %v36_v0 = vld [vmem:[#allocation5] sm:$0x7f] }
  0x26   :  { %s55_s5 = sshll.u32 %s142_s4, 4  ;;  %v37_v1 = vld [vmem:[#allocation2] sm:$0x7f]  ;;  %v38_v2 = vld [vmem:[#allocation2 + $0x8] sm:$0x7f]  ;;  %s56_s5 = int_to_ptr.vmem [resolvable:$true] %s55_s5 }
  0x27   :  { %v41_v3 = vadd.f32 %v37_v1, %v36_v0  ;;  %v42_v4 = vadd.f32 %v38_v2, %v36_v0  ;;  %v39_v5 = vld [vmem:[#allocation2 + $0x10] sm:$0x7f]  ;;  %v40_v6 = vld [vmem:[#allocation2 + $0x18] sm:$0x7f]  ;;  %s112_s1 = scalar_lea.vmem %s56_s5, 512  ;;  %p117_p3 = scmp.lt.s32.totalorder %s56_s5, %s56_s5 }
  0x28   :  { %v43_v7 = vadd.f32 %v39_v5, %v36_v0  ;;  %v44_v8 = vadd.f32 %v40_v6, %v36_v0  ;;  %p113_p2 = scmp.ne.s32.totalorder %s56_s5, %s112_s1  ;;  %p118_p4 = scmp.lt.s32.totalorder %s112_s1, %s112_s1 }
  0x29   :  { %45 = vst [vmem:[#allocation7] sm:$0x7f] %v41_v3  ;;  %46 = vst [vmem:[#allocation7 + $0x8] sm:$0x7f] %v42_v4 }
  0x2a   :  { %47 = vst [vmem:[#allocation7 + $0x10] sm:$0x7f] %v43_v7  ;;  %48 = vst [vmem:[#allocation7 + $0x18] sm:$0x7f] %v44_v8  ;;  %p119_p5 = por %p118_p4, %p117_p3 }
  0x2c   :  { %p120_p6 = pnand %p119_p5, %p113_p2 }
  0x2e   :  { %123 = shalt.err (!%p120_p6)
}
  0x2f   :  { %s124_s8 = scalar_lea.hbm %s196_s2, 512 }
  0x30   :  { %p125_p7 = scmp.ne.s32.totalorder %s196_s2, %s124_s8  ;;  %p128_p8 = scmp.lt.u32.totalorder %s124_s8, %s196_s2 }
  0x32   :  { %p130_p9 = pnand %p128_p8, %p125_p7 }
  0x34   :  { %133 = shalt.err (!%p130_p9)
}
  0x35   :  { %58 = dma.vmem_to_hbm [thread:$0]  %s56_s5, 512, %s196_s2, [#allocation4]  }
  0x36   :  { %138 = dma.done.wait [#allocation4], 512  }
  0x37   :  { %139 = vsyncadd [#allocation4], 4294966784 }
  0x38   :  { %62 = vsyncpa [#allocation3], 1 }
  0x39   :  { %63 = vsyncpa [#allocation6], 1 }
  0x3a   :  { %64 = vsyncpa [#allocation4], 1 }

</bundles_post_ra>
